<compile_context>
chip_gen: v6e
topology: v6e:2x2x1
jax: 0.10.0
libtpu: 0.0.40
codegen_flags: <defaults>
</compile_context>

<pallas_src>
import jax
import jax.numpy as jnp
from jax.experimental import pallas as pl
from jax.experimental.pallas import tpu as pltpu

_SUBLANE = 8
_DEFAULT_SCOPED_VMEM = 32 * 1024 * 1024  # bytes; conservative across v5e/v6e/v7x


def _round_up(x, m):
    return ((x + m - 1) // m) * m


def mlp_kernel(x_ref, w1_ref, b1_ref, w2_ref, b2_ref, o_ref):
    # x_ref:  (tile_n, F)   w1_ref: (F, H)   b1_ref: (1, H)  [f32]
    # w2_ref: (H, L)        b2_ref: (1, L)   o_ref:  (tile_n, L)
    # x is cast to the weight dtype in-kernel (no wrapper-side astype pass).
    x = x_ref[...].astype(w1_ref.dtype)
    h = jnp.dot(x, w1_ref[...], preferred_element_type=jnp.float32) + b1_ref[...]
    h = jnp.tanh(h)                                    # f32 on the EUP
    out = jnp.dot(h.astype(w2_ref.dtype), w2_ref[...],
                  preferred_element_type=jnp.float32) + b2_ref[...]
    o_ref[...] = out.astype(o_ref.dtype)


def mlp_forward(x, w1, b1, w2, b2, *, tile_n=None, compute_dtype=None):
    """Fused MLP forward: tanh(x @ w1 + b1) @ w2 + b2.

    x:  [N, F]   w1: [F, H]   b1: [1, H]   w2: [H, L]   b2: [1, L]
    Returns [N, L] in x's original dtype.
    """
    N, F = x.shape
    H = w1.shape[1]
    L = w2.shape[1]
    out_dtype = x.dtype

    # Reduced-precision matmul inputs: cast only the tiny weights here; x is
    # cast inside the kernel so its single HBM read is not duplicated.
    if compute_dtype is not None:
        w1 = w1.astype(compute_dtype)
        w2 = w2.astype(compute_dtype)
    b1 = b1.astype(jnp.float32)
    b2 = b2.astype(jnp.float32)

    # Tile choice: guarantee >= 2 grid steps for moderate N (v7x megacore can
    # shard the parallel axis across both TCs); cap at 1024 rows per tile.
    if tile_n is None:
        tile_n = min(1024, max(_SUBLANE, _round_up(pl.cdiv(N, 2), _SUBLANE)))
    tile_n = max(_SUBLANE, _round_up(tile_n, _SUBLANE))
    grid = (pl.cdiv(N, tile_n),)   # ragged last block handled by Pallas

    # VMEM guard: weights are grid-invariant but still double-buffered by the
    # pipeline; raise the scoped-VMEM limit only when the working set needs it.
    isz = lambda a: jnp.dtype(a.dtype).itemsize
    vmem_est = 2 * (
        tile_n * F * isz(x)
        + tile_n * L * jnp.dtype(out_dtype).itemsize
        + F * H * isz(w1) + H * isz(b1)
        + H * L * isz(w2) + L * isz(b2)
    )
    vmem_limit = None
    if vmem_est > _DEFAULT_SCOPED_VMEM:
        # TODO(synk): for very large F/H (weights alone near the VMEM budget,
        # esp. v7x's 64 MiB), add an "arbitrary" K-tiling axis over F with an
        # f32 VMEM accumulator instead of whole-weight residency.
        vmem_limit = min(int(vmem_est * 1.25), 64 * 1024 * 1024)

    cost = pl.CostEstimate(
        flops=2 * N * F * H + 2 * N * H * L,
        transcendentals=N * H,
        bytes_accessed=int(
            x.size * isz(x)
            + w1.size * isz(w1) + b1.size * isz(b1)
            + w2.size * isz(w2) + b2.size * isz(b2)
            + N * L * jnp.dtype(out_dtype).itemsize
        ),
    )

    return pl.pallas_call(
        mlp_kernel,
        out_shape=jax.ShapeDtypeStruct((N, L), out_dtype),
        grid_spec=pltpu.PrefetchScalarGridSpec(
            num_scalar_prefetch=0,
            grid=grid,
            in_specs=[
                pl.BlockSpec((tile_n, F), lambda i: (i, 0)),  # x row tile
                pl.BlockSpec((F, H), lambda i: (0, 0)),       # dense weight (resident)
                pl.BlockSpec((1, H), lambda i: (0, 0)),       # dense bias
                pl.BlockSpec((H, L), lambda i: (0, 0)),       # out_proj weight (resident)
                pl.BlockSpec((1, L), lambda i: (0, 0)),       # out_proj bias
            ],
            out_specs=pl.BlockSpec((tile_n, L), lambda i: (i, 0)),
        ),
        compiler_params=pltpu.CompilerParams(
            dimension_semantics=("parallel",),
            vmem_limit_bytes=vmem_limit,
        ),
        cost_estimate=cost,
    )(x, w1, b1, w2, b2)


if __name__ == "__main__":
    # Small, module-consistent shapes:
    #   num_feats=32, hidden_size=32, num_labels=4, N=128 rows.
    N, NUM_FEATS, HIDDEN, NUM_LABELS = 128, 32, 32, 4

    key = jax.random.PRNGKey(0)
    k_x, k_w1, k_b1, k_w2, k_b2 = jax.random.split(key, 5)

    x = jax.random.normal(k_x, (N, NUM_FEATS), dtype=jnp.float32)

    # Deterministic parameter init (mimicking nn.Linear uniform(-1/sqrt(in), 1/sqrt(in))),
    # stored transposed as [in, out] for the kernel.
    lim1 = 1.0 / (NUM_FEATS ** 0.5)
    w1 = jax.random.uniform(k_w1, (NUM_FEATS, HIDDEN), jnp.float32, -lim1, lim1)
    b1 = jax.random.uniform(k_b1, (1, HIDDEN), jnp.float32, -lim1, lim1)

    lim2 = 1.0 / (HIDDEN ** 0.5)
    w2 = jax.random.uniform(k_w2, (HIDDEN, NUM_LABELS), jnp.float32, -lim2, lim2)
    b2 = jax.random.uniform(k_b2, (1, NUM_LABELS), jnp.float32, -lim2, lim2)

    # Pure-JAX reference.
    ref = jnp.tanh(x @ w1 + b1) @ w2 + b2

    # Default (f32) path: >= 2 grid steps at this N, no padding anywhere.
    out = jax.block_until_ready(mlp_forward(x, w1, b1, w2, b2))
    assert out.shape == (N, NUM_LABELS)
    assert jnp.allclose(out, ref, atol=1e-5, rtol=1e-5)

    # Ragged-N / multi-step path: N=100 with 48-row tiles (OOB last block).
    out_ragged = jax.block_until_ready(
        mlp_forward(x[:100], w1, b1, w2, b2, tile_n=48))
    assert out_ragged.shape == (100, NUM_LABELS)
    assert jnp.allclose(out_ragged, ref[:100], atol=1e-5, rtol=1e-5)

    # Reduced-precision (bf16 matmul inputs, f32 accumulate) path, loose tol.
    out_bf16 = jax.block_until_ready(
        mlp_forward(x, w1, b1, w2, b2, compute_dtype=jnp.bfloat16))
    assert out_bf16.shape == (N, NUM_LABELS)
    assert jnp.allclose(out_bf16, ref, atol=5e-2, rtol=5e-2)

    print("KERNEL_OK")
</pallas_src>

<mosaic_0001>
module attributes {stable_mosaic.version = 11 : i64} {
  func.func @mlp_kernel(%arg0: i32, %arg1: memref<64x32xf32, #tpu.memory_space<vmem>>, %arg2: memref<32x32xf32, #tpu.memory_space<vmem>>, %arg3: memref<1x32xf32, #tpu.memory_space<vmem>>, %arg4: memref<32x4xf32, #tpu.memory_space<vmem>>, %arg5: memref<1x4xf32, #tpu.memory_space<vmem>>, %arg6: memref<64x4xf32, #tpu.memory_space<vmem>>) attributes {dimension_semantics = [#tpu.dimension_semantics<parallel>], iteration_bounds = array<i64: 2>, scalar_prefetch = 0 : i64, scratch_operands = 0 : i64, tpu.core_type = #tpu.core_type<tc>, window_params = [{transform_indices = @transform_0, window_bounds = array<i64: 64, 32>}, {pipeline_mode = #tpu.pipeline_mode<synchronous>, transform_indices = @transform_1, window_bounds = array<i64: 32, 32>}, {pipeline_mode = #tpu.pipeline_mode<synchronous>, transform_indices = @transform_2, window_bounds = array<i64: 1, 32>}, {pipeline_mode = #tpu.pipeline_mode<synchronous>, transform_indices = @transform_3, window_bounds = array<i64: 32, 4>}, {pipeline_mode = #tpu.pipeline_mode<synchronous>, transform_indices = @transform_4, window_bounds = array<i64: 1, 4>}, {transform_indices = @transform_5, window_bounds = array<i64: 64, 4>}]} {
    %c0 = arith.constant 0 : index
    %c0_0 = arith.constant 0 : index
    %0 = vector.load %arg1[%c0, %c0_0] : memref<64x32xf32, #tpu.memory_space<vmem>>, vector<64x32xf32>
    %c0_1 = arith.constant 0 : index
    %c0_2 = arith.constant 0 : index
    %1 = vector.load %arg2[%c0_1, %c0_2] : memref<32x32xf32, #tpu.memory_space<vmem>>, vector<32x32xf32>
    %cst = arith.constant dense<0.000000e+00> : vector<64x32xf32>
    %2 = tpu.matmul %0, %1, %cst {dimension_numbers = #tpu.dot_dimension_numbers<[1], [0], [0], [1], [0, 0, 1, 1], [], []>} : vector<64x32xf32>, vector<32x32xf32>, vector<64x32xf32> -> vector<64x32xf32>
    %c0_3 = arith.constant 0 : index
    %c0_4 = arith.constant 0 : index
    %3 = vector.load %arg3[%c0_3, %c0_4] : memref<1x32xf32, #tpu.memory_space<vmem>>, vector<1x32xf32>
    %4 = vector.broadcast %3 : vector<1x32xf32> to vector<64x32xf32>
    %5 = arith.addf %2, %4 : vector<64x32xf32>
    %6 = math.tanh %5 : vector<64x32xf32>
    %c0_5 = arith.constant 0 : index
    %c0_6 = arith.constant 0 : index
    %7 = vector.load %arg4[%c0_5, %c0_6] : memref<32x4xf32, #tpu.memory_space<vmem>>, vector<32x4xf32>
    %cst_7 = arith.constant dense<0.000000e+00> : vector<64x4xf32>
    %8 = tpu.matmul %6, %7, %cst_7 {dimension_numbers = #tpu.dot_dimension_numbers<[1], [0], [0], [1], [0, 0, 1, 1], [], []>} : vector<64x32xf32>, vector<32x4xf32>, vector<64x4xf32> -> vector<64x4xf32>
    %c0_8 = arith.constant 0 : index
    %c0_9 = arith.constant 0 : index
    %9 = vector.load %arg5[%c0_8, %c0_9] : memref<1x4xf32, #tpu.memory_space<vmem>>, vector<1x4xf32>
    %10 = vector.broadcast %9 : vector<1x4xf32> to vector<64x4xf32>
    %11 = arith.addf %8, %10 : vector<64x4xf32>
    %c0_10 = arith.constant 0 : index
    %c0_11 = arith.constant 0 : index
    %12 = vector.load %arg6[%c0_10, %c0_11] : memref<64x4xf32, #tpu.memory_space<vmem>>, vector<64x4xf32>
    tpu.vector_store %arg6[%c0_10, %c0_11], %11 {strides = array<i32>} : memref<64x4xf32, #tpu.memory_space<vmem>>, vector<64x4xf32>,
    return
  }
  func.func @transform_0(%arg0: i32) -> (i32, i32) {
    %c0_i32 = arith.constant 0 : i32
    %c0_i32_0 = arith.constant 0 : i32
    return %arg0, %c0_i32 : i32, i32
  }
  func.func @transform_1(%arg0: i32) -> (i32, i32) {
    %c0_i32 = arith.constant 0 : i32
    %c0_i32_0 = arith.constant 0 : i32
    %c0_i32_1 = arith.constant 0 : i32
    return %c0_i32, %c0_i32_0 : i32, i32
  }
  func.func @transform_2(%arg0: i32) -> (i32, i32) {
    %c0_i32 = arith.constant 0 : i32
    %c0_i32_0 = arith.constant 0 : i32
    %c0_i32_1 = arith.constant 0 : i32
    return %c0_i32, %c0_i32_0 : i32, i32
  }
  func.func @transform_3(%arg0: i32) -> (i32, i32) {
    %c0_i32 = arith.constant 0 : i32
    %c0_i32_0 = arith.constant 0 : i32
    %c0_i32_1 = arith.constant 0 : i32
    return %c0_i32, %c0_i32_0 : i32, i32
  }
  func.func @transform_4(%arg0: i32) -> (i32, i32) {
    %c0_i32 = arith.constant 0 : i32
    %c0_i32_0 = arith.constant 0 : i32
    %c0_i32_1 = arith.constant 0 : i32
    return %c0_i32, %c0_i32_0 : i32, i32
  }
  func.func @transform_5(%arg0: i32) -> (i32, i32) {
    %c0_i32 = arith.constant 0 : i32
    %c0_i32_0 = arith.constant 0 : i32
    return %arg0, %c0_i32 : i32, i32
  }
}

</mosaic_0001>

<bundles_post_ra>
// kernel: tpu_custom_call.1
= control target key start
LH: loop header
LB: loop body
LE: loop exit
PB: predicated region body
PF: predicated region fallthrough
CT: control target
= control target key end

     0   :  { %s745_s18 = smov 0   ;;  %s823_s0 = inlined_call_operand.vmem [shape: f32[128,32], index: 0, kind: input, shape index: {}]   ;;  %s824_s1 = inlined_call_operand.vmem [shape: f32[32,32], index: 1, kind: input, shape index: {}]   ;;  %s825_s2 = inlined_call_operand.vmem [shape: f32[1,32], index: 2, kind: input, shape index: {}]   ;;  %s826_s3 = inlined_call_operand.vmem [shape: f32[32,4], index: 3, kind: input, shape index: {}]   ;;  %s827_s4 = inlined_call_operand.vmem [shape: f32[1,4], index: 4, kind: input, shape index: {}]   ;;  %s828_s5 = inlined_call_operand.vmem [shape: f32[128,4], index: 5, kind: output, shape index: {}]  }
   0x1 LB: > { %s590_s19 = sadd.s32 4294967295, %s713_s18   ;;  %p594_p0 = scmp.ge.s32.totalorder %s713_s18, 1  ;;  %s713_s18 = sphi %s745_s18, %s15_s18  }
   0x2   : > { %p188_p1 = scmp.lt.s32.totalorder %s713_s18, 3 }
   0x4   : > { %p189_p2 = pnand %p594_p0, %p188_p1 }
   0x5   : > { %s595_s24 = sshll.u32 (!%p189_p2), %s590_s19, 3 }
   0x6   : > { %192 = sbr.rel (%p189_p2) target bundleno = 442 (0x1ba), region = 40  ;;  %p217_p3 = scmp.lt.s32.totalorder (!%p189_p2), %s595_s24, 15 }
   0xb   : > { %v239_v0 = vld [vmem:[%s824_s1 + $0x18] sm:$0xff]  ;;  %v238_v1 = vld [vmem:[%s824_s1 + $0x10] sm:$0xff]  ;;  %v237_v2 = vld [vmem:[%s824_s1 + $0x8] sm:$0xff]  ;;  %s830_s24 = smov (!%p217_p3, %s595_s24), 15  ;;  %vm247_vm0 = vcmask 261120   ;;  %vm525_vm1 = vcmask 31744  }
   0xc   : > { %643 = vmatprep.subr.mxu0 %v239_v0  ;;  %v236_v3 = vld [vmem:[%s824_s1] sm:$0xff]  ;;  %s596_s29 = sshll.u32 %s830_s24, 3  ;;  %v388_v12 = vld [vmem:[%s826_s3 + $0x18] sm:$0xff]  ;;  %v387_v13 = vld [vmem:[%s826_s3 + $0x10] sm:$0xff] }
   0xd   : > { %644 = vmatpush3.msra.mxu0 %v239_v0  ;;  %s220_s7 = scalar_lea.vmem %s823_s0, %s596_s29  ;;  %663 = vmatprep.subr.mxu1 %v388_v12  ;;  %v386_v14 = vld [vmem:[%s826_s3 + $0x8] sm:$0xff]  ;;  %v385_v15 = vld [vmem:[%s826_s3] sm:$0xff]  ;;  %s226_s23 = scalar_lea.vmem %s828_s5, %s596_s29 }
   0xe   : > { %645 = vmatprep.subr.mxu0 %v238_v1  ;;  %v228_v4 = vld [vmem:[%s220_s7] sm:$0xff]  ;;  %v229_v5 = vld [vmem:[%s220_s7 + $0x8] sm:$0xff]  ;;  %v230_v6 = vld [vmem:[%s220_s7 + $0x10] sm:$0xff]  ;;  %664 = vmatpush3.msra.mxu1 %v388_v12 }
   0xf   : > { %646 = vmatpush3.msra.mxu0 %v238_v1  ;;  %651 = vmatprep.mubr.msk.f32.mxu0 %vm247_vm0, %v228_v4  ;;  %v231_v7 = vld [vmem:[%s220_s7 + $0x18] sm:$0xff]  ;;  %v232_v8 = vld [vmem:[%s220_s7 + $0x20] sm:$0xff]  ;;  %v233_v9 = vld [vmem:[%s220_s7 + $0x28] sm:$0xff] }
  0x10   : > { %647 = vmatprep.subr.mxu0 %v237_v2  ;;  %v234_v10 = vld [vmem:[%s220_s7 + $0x30] sm:$0xff]  ;;  %v235_v11 = vld [vmem:[%s220_s7 + $0x38] sm:$0xff]  ;;  %665 = vmatprep.subr.mxu1 %v387_v13  ;;  %v599_v16 = vld [vmem:[%s825_s2] ss:$0 sm:$0xff] }
  0x11   : > { %648 = vmatpush3.msra.mxu0 %v237_v2  ;;  %666 = vmatpush3.msra.mxu1 %v387_v13  ;;  %v608_v41 = vld [vmem:[%s827_s4] ss:$0 sm:$0xff] }
  0x12   : > { %649 = vmatprep.subr.mxu0 %v236_v3  ;;  %667 = vmatprep.subr.mxu1 %v386_v14 }
  0x13   : > { %650 = vmatpush3.msra.mxu0 %v236_v3  ;;  %668 = vmatpush3.msra.mxu1 %v386_v14 }
  0x14   : > { %652 = vmatmul.mubr.msk.f32.vlgmr.msra.gmra.mxu0 %vm247_vm0, %v229_v5  ;;  %669 = vmatprep.subr.mxu1 %v385_v15 }
  0x15   : > { %654 = vmatprep.mubr.msk.f32.mxu0 %vm247_vm0, %v230_v6  ;;  %670 = vmatpush3.msra.mxu1 %v385_v15 }
  0x18   : > { %655 = vmatmul.mubr.msk.f32.gmra.mxu0 %vm247_vm0, %v231_v7 }
  0x19   : > { %657 = vmatprep.mubr.msk.f32.mxu0 %vm247_vm0, %v232_v8 }
  0x1c   : > { %658 = vmatmul.mubr.msk.f32.gmra.mxu0 %vm247_vm0, %v233_v9 }
  0x1d   : > { %660 = vmatprep.mubr.msk.f32.mxu0 %vm247_vm0, %v234_v10 }
  0x20   : > { %661 = vmatmul.mubr.msk.f32.gmra.mxu0 %vm247_vm0, %v235_v11 }
  0xd4   : > { %v653_v17 = vpop.f32.mrf.mxu0 }
  0xd5   : > { %v344_v18 = vadd.f32 %v653_v17, %v599_v16 }
  0xd6   : > { %v338_v19 = vpop.f32.mrf.mxu0 }
  0xd7   : > { %v339_v20 = vadd.f32 %v599_v16, %v338_v19 }
  0xd8   : > { %v656_v21 = vpop.f32.mrf.mxu0 }
  0xd9   : > { %691 = vtanh.f32 %v339_v20  ;;  %v354_v22 = vadd.f32 %v656_v21, %v599_v16 }
  0xda   : > { %693 = vtanh.f32 %v344_v18  ;;  %v348_v23 = vpop.f32.mrf.mxu0 }
  0xdb   : > { %v349_v24 = vadd.f32 %v599_v16, %v348_v23 }
  0xdc   : > { %v659_v25 = vpop.f32.mrf.mxu0 }
  0xdd   : > { %695 = vtanh.f32 %v349_v24  ;;  %v364_v26 = vadd.f32 %v659_v25, %v599_v16 }
  0xde   : > { %697 = vtanh.f32 %v354_v22  ;;  %v358_v27 = vpop.f32.mrf.mxu0 }
  0xdf   : > { %v359_v28 = vadd.f32 %v599_v16, %v358_v27 }
  0xe0   : > { %v662_v29 = vpop.f32.mrf.mxu0 }
  0xe1   : > { %699 = vtanh.f32 %v359_v28  ;;  %v374_v30 = vadd.f32 %v662_v29, %v599_v16 }
  0xe2   : > { %701 = vtanh.f32 %v364_v26  ;;  %v368_v31 = vpop.f32.mrf.mxu0 }
  0xe3   : > { %v369_v32 = vadd.f32 %v599_v16, %v368_v31 }
  0xe5   : > { %703 = vtanh.f32 %v369_v32 }
  0xe6   : > { %v692_v33 = vpop.eup %691  ;;  %705 = vtanh.f32 %v374_v30 }
  0xe7   : > { %v694_v34 = vpop.eup %693  ;;  %671 = vmatprep.mubr.msk.f32.mxu1 %vm247_vm0, %v692_v33 }
  0xe8   : > { %672 = vmatmul.mubr.msk.f32.vlgmr.msra.gmra.mxu1 %vm247_vm0, %v694_v34 }
  0xea   : > { %v696_v35 = vpop.eup %695 }
  0xeb   : > { %v698_v36 = vpop.eup %697  ;;  %674 = vmatprep.mubr.msk.f32.mxu1 %vm247_vm0, %v696_v35 }
  0xec   : > { %675 = vmatmul.mubr.msk.f32.gmra.mxu1 %vm247_vm0, %v698_v36 }
  0xee   : > { %v700_v37 = vpop.eup %699 }
  0xef   : > { %v702_v38 = vpop.eup %701  ;;  %677 = vmatprep.mubr.msk.f32.mxu1 %vm247_vm0, %v700_v37 }
  0xf0   : > { %678 = vmatmul.mubr.msk.f32.gmra.mxu1 %vm247_vm0, %v702_v38 }
  0xf2   : > { %v704_v39 = vpop.eup %703 }
  0xf3   : > { %v706_v40 = vpop.eup %705  ;;  %680 = vmatprep.mubr.msk.f32.mxu1 %vm247_vm0, %v704_v39 }
  0xf4   : > { %681 = vmatmul.mubr.msk.f32.gmra.mxu1 %vm247_vm0, %v706_v40 }
 0x1a8   : > { %v673_v42 = vpop.f32.mrf.mxu1 }
 0x1a9   : > { %v492_v43 = vadd.f32 %v673_v42, %v608_v41 }
 0x1aa   : > { %v486_v44 = vpop.f32.mrf.mxu1 }
 0x1ab   : > { %527 = vst.msk [vmem:[%s226_s23 + $0x8] sm:$0xff] %vm525_vm1, %v492_v43  ;;  %v487_v45 = vadd.f32 %v608_v41, %v486_v44 }
 0x1ac   : > { %v676_v46 = vpop.f32.mrf.mxu1 }
 0x1ad   : > { %526 = vst.msk [vmem:[%s226_s23] sm:$0xff] %vm525_vm1, %v487_v45  ;;  %v502_v47 = vadd.f32 %v676_v46, %v608_v41 }
 0x1ae   : > { %v496_v48 = vpop.f32.mrf.mxu1 }
 0x1af   : > { %529 = vst.msk [vmem:[%s226_s23 + $0x18] sm:$0xff] %vm525_vm1, %v502_v47  ;;  %v497_v49 = vadd.f32 %v608_v41, %v496_v48 }
 0x1b0   : > { %v679_v50 = vpop.f32.mrf.mxu1 }
 0x1b1   : > { %528 = vst.msk [vmem:[%s226_s23 + $0x10] sm:$0xff] %vm525_vm1, %v497_v49  ;;  %v512_v51 = vadd.f32 %v679_v50, %v608_v41 }
 0x1b2   : > { %v506_v52 = vpop.f32.mrf.mxu1 }
 0x1b3   : > { %531 = vst.msk [vmem:[%s226_s23 + $0x28] sm:$0xff] %vm525_vm1, %v512_v51  ;;  %v507_v53 = vadd.f32 %v608_v41, %v506_v52 }
 0x1b4   : > { %v682_v54 = vpop.f32.mrf.mxu1 }
 0x1b5   : > { %530 = vst.msk [vmem:[%s226_s23 + $0x20] sm:$0xff] %vm525_vm1, %v507_v53  ;;  %v522_v55 = vadd.f32 %v682_v54, %v608_v41 }
 0x1b6   : > { %v516_v56 = vpop.f32.mrf.mxu1 }
 0x1b7   : > { %533 = vst.msk [vmem:[%s226_s23 + $0x38] sm:$0xff] %vm525_vm1, %v522_v55  ;;  %v517_v57 = vadd.f32 %v608_v41, %v516_v56 }
 0x1b9   : > { %532 = vst.msk [vmem:[%s226_s23 + $0x30] sm:$0xff] %vm525_vm1, %v517_v57 }
 0x1ba PF: > { %s15_s18 = sadd.s32 1, %s713_s18  }
 0x1bb   : > { %p12_p4 = scmp.ge.s32.totalorder %s15_s18, 4  }
 0x1bd   :  { %14 = sbr.rel (!%p12_p4) target bundleno = 1 (0x1), region = 70 }

</bundles_post_ra>
